<compile_context>
chip_gen: v5e
topology: v5e:2x2
jax: 0.10.0
libtpu: 0.0.40
codegen_flags: <defaults>
</compile_context>

<pallas_src>
import functools
import math

import jax
import jax.numpy as jnp
from jax import lax
from jax.experimental import pallas as pl
from jax.experimental.pallas import tpu as pltpu


_INNER_COLS = 2048  # columns consumed per inner loop step (multiple of 128)


def _cdiv(a: int, b: int) -> int:
    return -(-a // b)


def _round_up(a: int, b: int) -> int:
    return _cdiv(a, b) * b


def _partial_sums_kernel(x_ref, psum_ref, psq_ref, acc_sum, acc_sq, *,
                         n_true, tile_n, inner_cols, nj, needs_mask):
    """Per-row sum(x) and sum(x*x) for one (b-tile, reduction-split) pair.

    Grid: (b_tiles, n_split, nj).  Axis 2 is the streamed reduction ("arbitrary");
    axes 0/1 are "parallel" (megacore / v7x dual-TC sharding).
    """
    s = pl.program_id(1)            # which half of the N reduction (v7x split)
    j = pl.program_id(2)            # step within this split

    @pl.when(j == 0)
    def _():
        acc_sum[...] = jnp.zeros_like(acc_sum)
        acc_sq[...] = jnp.zeros_like(acc_sq)

    n_inner = tile_n // inner_cols
    block_start = (s * nj + j) * tile_n   # logical element offset of this block along N

    def step(xk, col_off, masked):
        xk = xk.astype(jnp.float32)
        if masked:
            # Zero columns beyond the true row length.  Covers the ragged last block and
            # fully-OOB duplicated blocks of an uneven split (valid <= 0 -> all masked).
            # Select (not multiply) so NaN/Inf garbage from the OOB DMA region cannot
            # propagate into the sums.
            col = lax.broadcasted_iota(jnp.int32, xk.shape, 1)
            valid = n_true - block_start - col_off
            xk = jnp.where(col < valid, xk, jnp.float32(0.0))
        acc_sum[...] += jnp.sum(xk, axis=1, keepdims=True)
        acc_sq[...] += jnp.sum(xk * xk, axis=1, keepdims=True)

    def accumulate(masked):
        if n_inner == 1:
            step(x_ref[...], 0, masked)
        else:
            def body(k, carry):
                off = pl.multiple_of(k * inner_cols, inner_cols)
                step(x_ref[:, pl.ds(off, inner_cols)], off, masked)
                return carry
            lax.fori_loop(0, n_inner, body, 0)

    if needs_mask:
        is_ragged = block_start + tile_n > n_true

        @pl.when(is_ragged)
        def _():
            accumulate(True)

        @pl.when(jnp.logical_not(is_ragged))
        def _():
            accumulate(False)
    else:
        accumulate(False)

    @pl.when(j == pl.num_programs(2) - 1)
    def _():
        psum_ref[...] = acc_sum[...][None]     # (1, tile_b, 1)
        psq_ref[...] = acc_sq[...][None]


def linear_regression_forward(x, weight, bias, *,
                              block_bytes=8 * 1024 * 1024, max_tile_n=None):
    """x: [B, ...] reduced over all non-batch dims; weight: [O, 2]; bias: [O] -> [B, O]."""
    B = x.shape[0]
    N = math.prod(x.shape[1:])
    O = weight.shape[0]

    x_flat = x.reshape(B, N)
    itemsize = jnp.dtype(x.dtype).itemsize
    sublane = {4: 8, 2: 16, 1: 32}.get(itemsize, 8)   # dtype-native min sublane tile

    # ---- dtype-aware tile sizing: grow tile_n toward full rows first -------------
    tile_b = B if B <= sublane else sublane
    lane_n = _round_up(N, 128)
    cap = max(128, (block_bytes // (tile_b * itemsize)) // 128 * 128)
    if max_tile_n is not None:
        cap = max(128, min(cap, (max_tile_n // 128) * 128))
    tile_n = min(lane_n, cap)
    if tile_n > _INNER_COLS:                      # keep divisible by the inner step
        tile_n = (tile_n // _INNER_COLS) * _INNER_COLS

    # Rows are short: spend the remaining block budget on more rows per block.
    if tile_n == lane_n and B > tile_b:
        rows_fit = max(1, block_bytes // (tile_n * itemsize))
        tile_b = min(_round_up(B, sublane),
                     max(sublane, (rows_fit // sublane) * sublane))

    nb = _cdiv(B, tile_b)
    b_pad = nb * tile_b

    total_nb = _cdiv(N, tile_n)
    # v7x has 2 TensorCores: with a single B tile, split the N reduction so both
    # cores stream half of x.  (Harmless size-1 grid axis on v5e/v6e.)
    if nb == 1 and total_nb == 1 and N > 2 * 128:
        tile_n = min(tile_n, _round_up(_cdiv(N, 2), 128))
        if tile_n > _INNER_COLS:
            tile_n = (tile_n // _INNER_COLS) * _INNER_COLS
        total_nb = _cdiv(N, tile_n)
    n_split = 2 if (nb == 1 and total_nb >= 2) else 1
    nj = _cdiv(total_nb, n_split)

    inner_cols = tile_n if tile_n <= _INNER_COLS else _INNER_COLS
    needs_mask = (N % tile_n != 0) or (n_split * nj != total_nb)

    # x is never padded; partially out-of-bounds blocks are masked in-kernel instead.
    if n_split * nj == total_nb:
        x_index_map = lambda i, s, j: (i, s * nj + j)
    else:
        last_block = total_nb - 1
        x_index_map = lambda i, s, j: (i, jnp.minimum(s * nj + j, last_block))

    kernel = functools.partial(
        _partial_sums_kernel, n_true=N, tile_n=tile_n, inner_cols=inner_cols,
        nj=nj, needs_mask=needs_mask)

    block_b = tile_b * tile_n * itemsize
    vmem_limit = min(48 * 1024 * 1024,
                     max(16 * 1024 * 1024, 2 * block_b + (8 << 20)))

    cost = pl.CostEstimate(
        flops=3 * B * N,
        transcendentals=0,
        bytes_accessed=B * N * itemsize + 2 * n_split * b_pad * 4,
    )

    psum, psq = pl.pallas_call(
        kernel,
        out_shape=(jax.ShapeDtypeStruct((n_split, b_pad, 1), jnp.float32),
                   jax.ShapeDtypeStruct((n_split, b_pad, 1), jnp.float32)),
        grid_spec=pltpu.PrefetchScalarGridSpec(
            num_scalar_prefetch=0,
            grid=(nb, n_split, nj),
            in_specs=[pl.BlockSpec((tile_b, tile_n), x_index_map)],
            out_specs=[pl.BlockSpec((1, tile_b, 1), lambda i, s, j: (s, i, 0)),
                       pl.BlockSpec((1, tile_b, 1), lambda i, s, j: (s, i, 0))],
            scratch_shapes=[pltpu.VMEM((tile_b, 1), jnp.float32),   # running sum(x)
                            pltpu.VMEM((tile_b, 1), jnp.float32)],  # running sum(x^2)
        ),
        compiler_params=pltpu.CompilerParams(
            dimension_semantics=("parallel", "parallel", "arbitrary"),
            vmem_limit_bytes=vmem_limit,
        ),
        cost_estimate=cost,
    )(x_flat)

    # ---- tiny finalize (negligible vs the x stream): combine the reduction splits,
    # then mean / unbiased std / Linear(2, O) on a [B, 2] feature matrix. ------------
    sums = jnp.sum(psum[:, :B, 0], axis=0)             # [B] f32
    sqs = jnp.sum(psq[:, :B, 0], axis=0)               # [B] f32
    mean = sums / jnp.float32(N)
    # One-pass unbiased variance; clamp guards catastrophic cancellation.
    # N == 1 -> 0/0 = NaN, matching torch.std_mean's unbiased behaviour.
    var = jnp.maximum(sqs - jnp.float32(N) * mean * mean, 0.0) / jnp.float32(N - 1)
    std = jnp.sqrt(var)
    feats = jnp.stack([std, mean], axis=1)              # torch.stack([std, mean], dim=1)
    out = feats @ weight.astype(jnp.float32).T + bias.astype(jnp.float32)
    return out.astype(jnp.promote_types(x.dtype, weight.dtype))


if __name__ == "__main__":
    key = jax.random.PRNGKey(0)
    k_x1, k_x2, k_x3, k_x4, k_w, k_b = jax.random.split(key, 6)

    def _reference(x, weight, bias):
        xf = x.reshape(x.shape[0], -1).astype(jnp.float32)
        mean = jnp.mean(xf, axis=1)
        std = jnp.std(xf, axis=1, ddof=1)     # unbiased, matches torch.std_mean
        feats = jnp.stack([std, mean], axis=1)
        return feats @ weight.astype(jnp.float32).T + bias.astype(jnp.float32)

    output_neurons = 8
    bound = 1.0 / math.sqrt(2.0)
    weight = jax.random.uniform(k_w, (output_neurons, 2), minval=-bound, maxval=bound,
                                dtype=jnp.float32)
    bias = jax.random.uniform(k_b, (output_neurons,), minval=-bound, maxval=bound,
                              dtype=jnp.float32)

    def _check(name, x, tol, **kwargs):
        out = jax.block_until_ready(linear_regression_forward(x, weight, bias, **kwargs))
        ref = _reference(x, weight, bias)
        assert out.shape == ref.shape, f"{name}: shape {out.shape} != {ref.shape}"
        assert jnp.allclose(out.astype(jnp.float32), ref, atol=tol, rtol=tol), \
            f"{name}: mismatch vs reference"

    # 1) Small 5-D NCDHW input (B=2, N=1024): single row tile, so the N reduction is
    #    split into two "parallel" halves (v7x dual-TC path), perfectly aligned.
    x1 = jax.random.normal(k_x1, (2, 4, 4, 8, 8), dtype=jnp.float32)
    _check("case1", x1, 1e-4)

    # 2) Ragged everything: B=10 (two B tiles + padded output rows), N=1000 (ragged
    #    last N tile), multi-step streaming reduction via forced small tiles.
    x2 = jax.random.normal(k_x2, (10, 5, 4, 5, 10), dtype=jnp.float32)
    _check("case2", x2, 1e-4, max_tile_n=512)

    # 3) Uneven reduction split: N=1300 -> 3 blocks of 512 shared by 2 splits,
    #    exercising the clamped duplicated (fully masked) block path.
    x3 = jax.random.normal(k_x3, (2, 5, 4, 5, 13), dtype=jnp.float32)
    _check("case3", x3, 1e-4, max_tile_n=512)

    # 4) bf16 input: dtype-aware (16, 128) tiling, ragged N, B > sublane.
    x4 = jax.random.normal(k_x4, (20, 4, 6, 6, 6), dtype=jnp.bfloat16)
    _check("case4", x4, 1e-2)

    print("KERNEL_OK")
</pallas_src>

<mosaic_0001>
module attributes {stable_mosaic.version = 11 : i64} {
  func.func @_partial_sums_kernel(%arg0: i32, %arg1: i32, %arg2: i32, %arg3: memref<2x512xf32, #tpu.memory_space<vmem>>, %arg4: memref<1x2x1xf32, #tpu.memory_space<vmem>>, %arg5: memref<1x2x1xf32, #tpu.memory_space<vmem>>, %arg6: memref<2x1xf32, #tpu.memory_space<vmem>>, %arg7: memref<2x1xf32, #tpu.memory_space<vmem>>) attributes {dimension_semantics = [#tpu.dimension_semantics<parallel>, #tpu.dimension_semantics<parallel>, #tpu.dimension_semantics<arbitrary>], iteration_bounds = array<i64: 1, 2, 1>, scalar_prefetch = 0 : i64, scratch_operands = 2 : i64, tpu.core_type = #tpu.core_type<tc>, window_params = [{transform_indices = @transform_0, window_bounds = array<i64: 2, 512>}, {transform_indices = @transform_1, window_bounds = array<i64: 1, 2, 1>}, {transform_indices = @transform_2, window_bounds = array<i64: 1, 2, 1>}]} {
    %c0_i32 = arith.constant 0 : i32
    %0 = arith.cmpi eq, %arg2, %c0_i32 : i32
    %1 = arith.extui %0 : i1 to i32
    %c0_i32_0 = arith.constant 0 : i32
    %2 = arith.cmpi ne, %1, %c0_i32_0 : i32
    scf.if %2 {
      %cst_13 = arith.constant 0.000000e+00 : f32
      %18 = vector.broadcast %cst_13 : f32 to vector<2x1xf32>
      %c0_14 = arith.constant 0 : index
      %c0_15 = arith.constant 0 : index
      %19 = vector.load %arg6[%c0_14, %c0_15] : memref<2x1xf32, #tpu.memory_space<vmem>>, vector<2x1xf32>
      tpu.vector_store %arg6[%c0_14, %c0_15], %18 {strides = array<i32>} : memref<2x1xf32, #tpu.memory_space<vmem>>, vector<2x1xf32>,
      %cst_16 = arith.constant 0.000000e+00 : f32
      %20 = vector.broadcast %cst_16 : f32 to vector<2x1xf32>
      %c0_17 = arith.constant 0 : index
      %c0_18 = arith.constant 0 : index
      %21 = vector.load %arg7[%c0_17, %c0_18] : memref<2x1xf32, #tpu.memory_space<vmem>>, vector<2x1xf32>
      tpu.vector_store %arg7[%c0_17, %c0_18], %20 {strides = array<i32>} : memref<2x1xf32, #tpu.memory_space<vmem>>, vector<2x1xf32>,
    } else {
    }
    %c0 = arith.constant 0 : index
    %c0_1 = arith.constant 0 : index
    %3 = vector.load %arg3[%c0, %c0_1] : memref<2x512xf32, #tpu.memory_space<vmem>>, vector<2x512xf32>
    %c0_2 = arith.constant 0 : index
    %c0_3 = arith.constant 0 : index
    %4 = vector.load %arg6[%c0_2, %c0_3] : memref<2x1xf32, #tpu.memory_space<vmem>>, vector<2x1xf32>
    %cst = arith.constant dense<0.000000e+00> : vector<2xf32>
    %5 = vector.multi_reduction <add>, %3, %cst [1] : vector<2x512xf32> to vector<2xf32>
    %6 = vector.shape_cast %5 : vector<2xf32> to vector<2x1xf32>
    %7 = arith.addf %4, %6 : vector<2x1xf32>
    %c0_4 = arith.constant 0 : index
    %c0_5 = arith.constant 0 : index
    %8 = vector.load %arg6[%c0_4, %c0_5] : memref<2x1xf32, #tpu.memory_space<vmem>>, vector<2x1xf32>
    tpu.vector_store %arg6[%c0_4, %c0_5], %7 {strides = array<i32>} : memref<2x1xf32, #tpu.memory_space<vmem>>, vector<2x1xf32>,
    %c0_6 = arith.constant 0 : index
    %c0_7 = arith.constant 0 : index
    %9 = vector.load %arg7[%c0_6, %c0_7] : memref<2x1xf32, #tpu.memory_space<vmem>>, vector<2x1xf32>
    %10 = arith.mulf %3, %3 : vector<2x512xf32>
    %cst_8 = arith.constant dense<0.000000e+00> : vector<2xf32>
    %11 = vector.multi_reduction <add>, %10, %cst_8 [1] : vector<2x512xf32> to vector<2xf32>
    %12 = vector.shape_cast %11 : vector<2xf32> to vector<2x1xf32>
    %13 = arith.addf %9, %12 : vector<2x1xf32>
    %c0_9 = arith.constant 0 : index
    %c0_10 = arith.constant 0 : index
    %14 = vector.load %arg7[%c0_9, %c0_10] : memref<2x1xf32, #tpu.memory_space<vmem>>, vector<2x1xf32>
    tpu.vector_store %arg7[%c0_9, %c0_10], %13 {strides = array<i32>} : memref<2x1xf32, #tpu.memory_space<vmem>>, vector<2x1xf32>,
    %c0_i32_11 = arith.constant 0 : i32
    %15 = arith.cmpi eq, %arg2, %c0_i32_11 : i32
    %16 = arith.extui %15 : i1 to i32
    %c0_i32_12 = arith.constant 0 : i32
    %17 = arith.cmpi ne, %16, %c0_i32_12 : i32
    scf.if %17 {
      %c0_13 = arith.constant 0 : index
      %c0_14 = arith.constant 0 : index
      %18 = vector.load %arg6[%c0_13, %c0_14] : memref<2x1xf32, #tpu.memory_space<vmem>>, vector<2x1xf32>
      %19 = vector.shape_cast %18 : vector<2x1xf32> to vector<1x2x1xf32>
      %c0_15 = arith.constant 0 : index
      %c0_16 = arith.constant 0 : index
      %c0_17 = arith.constant 0 : index
      %20 = vector.load %arg4[%c0_15, %c0_16, %c0_17] : memref<1x2x1xf32, #tpu.memory_space<vmem>>, vector<1x2x1xf32>
      tpu.vector_store %arg4[%c0_15, %c0_16, %c0_17], %19 {strides = array<i32>} : memref<1x2x1xf32, #tpu.memory_space<vmem>>, vector<1x2x1xf32>,
      %c0_18 = arith.constant 0 : index
      %c0_19 = arith.constant 0 : index
      %21 = vector.load %arg7[%c0_18, %c0_19] : memref<2x1xf32, #tpu.memory_space<vmem>>, vector<2x1xf32>
      %22 = vector.shape_cast %21 : vector<2x1xf32> to vector<1x2x1xf32>
      %c0_20 = arith.constant 0 : index
      %c0_21 = arith.constant 0 : index
      %c0_22 = arith.constant 0 : index
      %23 = vector.load %arg5[%c0_20, %c0_21, %c0_22] : memref<1x2x1xf32, #tpu.memory_space<vmem>>, vector<1x2x1xf32>
      tpu.vector_store %arg5[%c0_20, %c0_21, %c0_22], %22 {strides = array<i32>} : memref<1x2x1xf32, #tpu.memory_space<vmem>>, vector<1x2x1xf32>,
    } else {
    }
    return
  }
  func.func @transform_0(%arg0: i32, %arg1: i32, %arg2: i32) -> (i32, i32) {
    %c1_i32 = arith.constant 1 : i32
    %0 = arith.muli %arg1, %c1_i32 : i32
    %1 = arith.addi %0, %arg2 : i32
    %c0_i32 = arith.constant 0 : i32
    return %arg0, %1 : i32, i32
  }
  func.func @transform_1(%arg0: i32, %arg1: i32, %arg2: i32) -> (i32, i32, i32) {
    %c0_i32 = arith.constant 0 : i32
    %c0_i32_0 = arith.constant 0 : i32
    return %arg1, %arg0, %c0_i32 : i32, i32, i32
  }
  func.func @transform_2(%arg0: i32, %arg1: i32, %arg2: i32) -> (i32, i32, i32) {
    %c0_i32 = arith.constant 0 : i32
    %c0_i32_0 = arith.constant 0 : i32
    return %arg1, %arg0, %c0_i32 : i32, i32, i32
  }
}

</mosaic_0001>

<bundles_post_ra>
// kernel: tpu_custom_call.1
= control target key start
LH: loop header
LB: loop body
LE: loop exit
PB: predicated region body
PF: predicated region fallthrough
CT: control target
= control target key end

     0   :  { %8 = vsyncpa [#allocation5], 0  ;;  %s683_s0 = inlined_call_operand.hbm [shape: f32[2,1024], index: 0, kind: input, shape index: {}]   ;;  %s684_s1 = inlined_call_operand.vmem [shape: f32[2,2,1], index: 1, kind: output, shape index: {0}]   ;;  %s685_s2 = inlined_call_operand.vmem [shape: f32[2,2,1], index: 2, kind: output, shape index: {1}]  }
   0x1   :  { %10 = vsyncpa [#allocation5 + $0x1], 0  ;;  %s578_s9 = smov 0   ;;  %s580_s10 = smov 0  }
   0x2   :  { %s582_s11 = smov 0   ;;  %s584_s12 = smov 0  }
   0x3   :  { %s586_s13 = smov 0   ;;  %s588_s14 = smov 0  }
   0x4 LB: > { %s410_s15 = sadd.s32 4294967295, %s560_s14   ;;  %s31_s16 = sadd.s32 1, %s556_s13  ;;  %s560_s14 = sphi %s588_s14, %s16_s14   ;;  %s556_s13 = sphi %s586_s13, %s692_s13   ;;  %s552_s12 = sphi %s584_s12, %s691_s12   ;;  %s548_s11 = sphi %s582_s11, %s690_s11   ;;  %s544_s10 = sphi %s580_s10, %s689_s10   ;;  %s540_s9 = sphi %s578_s9, %s688_s9  }
   0x5   : > { %p33_p0 = scmp.ge.s32.totalorder %s31_s16, 2  ;;  %s46_s17 = sadd.s32 1, %s548_s11 }
   0x6   : > { %p53_p1 = scmp.ne.s32.totalorder %s548_s11, %s544_s10  ;;  %p54_p2 = scmp.eq.s32.totalorder %s560_s14, 0 }
   0x7   : > { %s694_s16 = smov (%p33_p0, %s31_s16), 0  ;;  %p59_p4 = scmp.ne.s32.totalorder %s544_s10, %s540_s9 }
   0x8   : > { %p614_p3 = por %p54_p2, %p53_p1  ;;  %s42_s19 = ssub.s32 %s556_s13, %s694_s16 }
   0x9   : > { %p60_p5 = scmp.eq.s32.totalorder %s410_s15, 0  ;;  %p44_p6 = scmp.eq.s32.totalorder %s42_s19, 0 }
   0xa   : > { %p430_p8 = scmp.lt.s32.totalorder %s560_s14, 2  ;;  %s139_s22 = sand.u32 1, %s548_s11  }
   0xb   : > { %p621_p7 = por %p60_p5, %p59_p4  ;;  %s423_s23 = sshll.u32 %s556_s13, 3 }
   0xc   : > { %s627_s21 = scalar_select %p44_p6, %s548_s11, %s46_s17  }
   0xd   : > { %s414_s24 = sshll.u32 %s139_s22, 3  ;;  %s151_s27 = scalar_lea.hbm %s683_s0, %s423_s23 }
   0xe   : > { %s153_s28 = sshll.u32 %s151_s27, 4  ;;  %s143_s29 = scalar_lea.vmem [#allocation4], %s414_s24  ;;  %s154_s28 = int_to_ptr.hbm [resolvable:$true] %s153_s28 }
   0xf   : > { %s155_s30 = sshll.u32 %s143_s29, 4  ;;  %p427_p9 = pnand %p430_p8, %p614_p3  ;;  %s156_s30 = int_to_ptr.vmem [resolvable:$true] %s155_s30 }
  0x10   : > { %p417_p10 = scmp.ge.s32.totalorder %s560_s14, 1  ;;  %p160_p11 = scmp.lt.s32.totalorder %s560_s14, 3 }
  0x11   : > { %s140_s3 = scalar_lea.sflag [#allocation5], %s139_s22 }
  0x12   : > { %429 = dma.hbm_to_vmem [thread:$0]  (!%p427_p9), %s154_s28, 128, %s156_s30, %s140_s3  }
  0x13   : > { %p161_p12 = pnand %p417_p10, %p160_p11 }
  0x14   : > { %s166_s4 = sand.u32 (!%p161_p12), 1, %s544_s10  }
  0x15   : > { %164 = sbr.rel (%p161_p12) target bundleno = 182 (0xb6), region = 24  ;;  %s418_s5 = sshll.u32 (!%p161_p12), %s166_s4, 3 }
  0x16   : > { %s167_s6 = scalar_lea.sflag (!%p161_p12), [#allocation5], %s166_s4  ;;  %s170_s7 = scalar_lea.vmem (!%p161_p12), [#allocation4], %s418_s5 }
  0x1a   : > { %535 = dma.done.wait (%p621_p7), %s167_s6, 128  }
  0x1b   : > { %537 = vsyncadd (%p621_p7), %s167_s6, 4294967168  ;;  %vm221_vm0 = vcmask 1024   ;;  %v562_v0 = vmov 0.0   ;;  %v224_v1 = vld [vmem:[%s170_s7] sm:$0xff]  ;;  %vm236_vm1 = vcmask 1041408   ;;  %p203_p13 = scmp.lt.s32.totalorder %s552_s12, 1 }
  0x1c   : > { %222 = vst.msk [vmem:[#allocation2] sm:$0x3] %vm221_vm0, %v562_v0  ;;  %v250_v2 = vmul.f32 %v224_v1, %v224_v1 }
  0x1d   : > { %223 = vst.msk [vmem:[#allocation3] sm:$0x3] %vm221_vm0, %v562_v0  ;;  %s696_s12 = smov (!%p203_p13, %s552_s12), 1 }
  0x1e   : > { %227 = vst [vmem:[#allocation1] ss:$4 sm:$0xff] %v224_v1  ;;  %s419_s8 = sshll.u32 %s696_s12, 1 }
  0x1f   : > { %s209_s17 = scalar_lea.vmem %s684_s1, %s419_s8  ;;  %s216_s20 = scalar_lea.vmem %s685_s2, %s419_s8 }
  0x23   : > { %v225_v25 = vld [vmem:[#allocation2] sm:$0x3] }
  0x24   : > { %v249_v28 = vld [vmem:[#allocation3] sm:$0x3] }
  0x25   : > { %v228_v3 = vld.sshfl [vmem:[#allocation1] sm:$0xff pattern:$0x73625140]  ;;  %v229_v4 = vld.sshfl [vmem:[#allocation1 + $0x8] sm:$0xff pattern:$0x73625140] }
  0x26   : > { %v230_v5 = vld.sshfl [vmem:[#allocation1 + $0x10] sm:$0xff pattern:$0x73625140]  ;;  %v231_v6 = vld.sshfl [vmem:[#allocation1 + $0x18] sm:$0xff pattern:$0x73625140] }
  0x27   : > { %v237_v7 = vsel %vm236_vm1, %v228_v3, 0.0  ;;  %v238_v8 = vsel %vm236_vm1, %v229_v4, 0.0  ;;  %v240_v9 = vsel %vm236_vm1, %v230_v5, 0.0  ;;  %252 = vst [vmem:[#allocation1] ss:$4 sm:$0xff] %v250_v2  ;;  %v242_v11 = vsel %vm236_vm1, %v231_v6, 0.0 }
  0x28   : > { %v239_v10 = vadd.f32 %v238_v8, %v237_v7 }
  0x2a   : > { %v241_v12 = vadd.f32 %v240_v9, %v239_v10 }
  0x2c   : > { %v243_v13 = vadd.f32 %v242_v11, %v241_v12 }
  0x2e   : > { %244 = vadd.xlane.f32.xlu0 %v243_v13  ;;  %v253_v14 = vld.sshfl [vmem:[#allocation1] sm:$0xff pattern:$0x73625140]  ;;  %v254_v15 = vld.sshfl [vmem:[#allocation1 + $0x8] sm:$0xff pattern:$0x73625140] }
  0x2f   : > { %v255_v16 = vld.sshfl [vmem:[#allocation1 + $0x10] sm:$0xff pattern:$0x73625140]  ;;  %v256_v17 = vld.sshfl [vmem:[#allocation1 + $0x18] sm:$0xff pattern:$0x73625140] }
  0x30   : > { %v261_v18 = vsel %vm236_vm1, %v253_v14, 0.0  ;;  %v262_v19 = vsel %vm236_vm1, %v254_v15, 0.0  ;;  %v264_v20 = vsel %vm236_vm1, %v255_v16, 0.0  ;;  %v266_v22 = vsel %vm236_vm1, %v256_v17, 0.0 }
  0x31   : > { %v263_v21 = vadd.f32 %v262_v19, %v261_v18 }
  0x33   : > { %v265_v23 = vadd.f32 %v264_v20, %v263_v21 }
  0x35   : > { %v267_v24 = vadd.f32 %v266_v22, %v265_v23 }
  0x37   : > { %268 = vadd.xlane.f32.xlu0 %v267_v24 }
  0xa1   : > { %v245_v26 = vpop.xlane.xlu0 %244 }
  0xa2   : > { %v246_v27 = vadd.f32 %v245_v26, %v225_v25 }
  0xa4   : > { %248 = vst.msk [vmem:[#allocation2] sm:$0x3] %vm221_vm0, %v246_v27 }
  0xaa   : > { %v269_v29 = vpop.xlane.xlu0 %268 }
  0xab   : > { %v275_v30 = vld [vmem:[#allocation2] sm:$0x3]  ;;  %v270_v31 = vadd.f32 %v269_v29, %v249_v28 }
  0xac   : > { %276 = vst.msk [vmem:[%s209_s17] sm:$0x3] %vm221_vm0, %v275_v30 }
  0xad   : > { %271 = vst.msk [vmem:[#allocation3] sm:$0x3] %vm221_vm0, %v270_v31 }
  0xb4   : > { %v277_v32 = vld [vmem:[#allocation3] sm:$0x3] }
  0xb5   : > { %278 = vst.msk [vmem:[%s216_s20] sm:$0x3] %vm221_vm0, %v277_v32 }
  0xb6 PF: > { %s16_s14 = sadd.s32 1, %s560_s14   ;;  %s688_s9 = smov %s544_s10 }
  0xb7   : > { %p13_p0 = scmp.ge.s32.totalorder %s16_s14, 4   ;;  %s689_s10 = smov %s548_s11 }
  0xb8   : > { %s690_s11 = smov %s627_s21  ;;  %s691_s12 = smov %s556_s13 }
  0xb9   : > { %s692_s13 = smov %s694_s16  ;;  %15 = sbr.rel (!%p13_p0) target bundleno = 4 (0x4), region = 84 }
  0xbe   :  { %324 = vsyncpa [#allocation5], 1 }
  0xbf   :  { %326 = vsyncpa [#allocation5 + $0x1], 1 }

</bundles_post_ra>
